<compile_context>
chip_gen: v7x
topology: tpu7x:2x2x1
jax: 0.10.0
libtpu: 0.0.40
codegen_flags: <defaults>
</compile_context>

<pallas_src>
import functools
import math

import jax
import jax.numpy as jnp
from jax.experimental import pallas as pl
from jax.experimental.pallas import tpu as pltpu

LOG_STD_MIN = -20.0
LOG_STD_MAX = 2.0
TANH_EPSILON = 1e-6                       # epsilon arg of TanhGaussianDistParams.forward
_HALF_LOG_2PI = 0.5 * math.log(2.0 * math.pi)
LANE = 128                                # per-head feature padding (lane-dense matmuls)
GROUP = 32                                # lanes per packed-output slot (4 * GROUP == LANE)


def _tanh_gaussian_kernel(*refs, num_hidden: int, action_dim: int):
    """Fused trunk + fused heads + tanh-Gaussian sampling / log-prob.

    Ref order:
      inputs : x, (w_h, b_h) * num_hidden, w_heads, b_heads, eps
      output : packed (tb, 128) = [ action | z | mu | std ] in 32-lane groups,
               with log_prob stored in lane `action_dim` of the action group.
    """
    num_in = 1 + 2 * num_hidden + 2 + 1
    in_refs = refs[:num_in]
    packed_ref = refs[num_in]

    x_ref = in_refs[0]
    hidden_refs = in_refs[1:1 + 2 * num_hidden]
    w_heads_ref, b_heads_ref, eps_ref = in_refs[1 + 2 * num_hidden:]

    # ---- MLP trunk: ReLU hidden layers (statically unrolled) ----
    h = x_ref[...]
    for li in range(num_hidden):
        w = hidden_refs[2 * li][...]
        b = hidden_refs[2 * li + 1][...]
        h = jnp.maximum(jnp.dot(h, w, preferred_element_type=jnp.float32) + b, 0.0)

    # ---- Fused Gaussian heads: one (tb,128) x (128,256) matmul ----
    heads = (jnp.dot(h, w_heads_ref[...], preferred_element_type=jnp.float32)
             + b_heads_ref[...])                         # (tb, 2*LANE)
    mu = heads[:, 0:GROUP]                               # mu head (identity activation)
    log_std = jnp.tanh(heads[:, LANE:LANE + GROUP])      # log_std head (128-aligned slice)
    log_std = LOG_STD_MIN + 0.5 * (LOG_STD_MAX - LOG_STD_MIN) * (log_std + 1.0)
    std = jnp.exp(log_std)

    # ---- Reparameterized sample + tanh squash ----
    eps = eps_ref[...]                                   # (tb, GROUP), zero in padded lanes
    z = mu + std * eps
    action = jnp.tanh(z)

    # ---- log_prob = Normal(mu,std).log_prob(z) - log(1 - tanh(z)^2 + eps) ----
    # (z - mu)/std == eps exactly under the reparameterization -> no divide needed.
    logp_el = (-0.5 * (eps * eps) - log_std - _HALF_LOG_2PI
               - jnp.log(1.0 - action * action + TANH_EPSILON))
    lane = jax.lax.broadcasted_iota(jnp.int32, logp_el.shape, 1)
    logp_el = jnp.where(lane < action_dim, logp_el, 0.0)        # mask padded lanes
    log_prob = jnp.sum(logp_el, axis=-1, keepdims=True)         # (tb, 1)

    # ---- Pack everything into one lane-dense 128-lane slab ----
    slot0 = jnp.where(lane == action_dim, log_prob, action)     # log_prob in a spare lane
    packed_ref[:, 0 * GROUP:1 * GROUP] = slot0
    packed_ref[:, 1 * GROUP:2 * GROUP] = z
    packed_ref[:, 2 * GROUP:3 * GROUP] = mu
    packed_ref[:, 3 * GROUP:4 * GROUP] = std


def _pad2(a: jax.Array, rows: int, cols: int) -> jax.Array:
    r, c = a.shape
    if r == rows and c == cols:
        return a
    return jnp.pad(a, ((0, rows - r), (0, cols - c)))


def tanh_gaussian_forward(params, x, eps, *, batch_tile: int = 1024):
    """Fused TanhGaussianDistParams forward.

    params: (hidden [(w, b), ...], (w_mu, b_mu), (w_ls, b_ls)); weights are [in, out].
    x: (B, input_size) f32.  eps: (B, action_dim) standard-normal noise.
    Returns (action, log_prob, z, mu, std) with the PyTorch module's shapes.
    """
    hidden_params, (w_mu, b_mu), (w_ls, b_ls) = params
    B, d_in = x.shape
    a_dim = w_mu.shape[1]
    num_hidden = len(hidden_params)
    P, G = LANE, GROUP

    if not (0 < a_dim < G):
        # TODO(synk): widen the packed-output group for action_dim >= 32.
        raise ValueError(f"action_dim must be in [1, {G - 1}] for the packed output")
    for (w, _) in hidden_params:
        if w.shape[1] > P:
            raise ValueError("hidden sizes must be <= 128 for lane padding")
    assert eps.shape == (B, a_dim)

    # ---- Pad weights to lane-dense shapes; fuse the two heads into one matmul ----
    weight_arrays = []
    rows = d_in
    for (w, b) in hidden_params:
        weight_arrays.append(_pad2(w, rows, P))
        weight_arrays.append(_pad2(b, 1, P))
        rows = P
    w_heads = jnp.concatenate([_pad2(w_mu, rows, P), _pad2(w_ls, rows, P)], axis=1)  # (P, 2P)
    b_heads = jnp.concatenate([_pad2(b_mu, 1, P), _pad2(b_ls, 1, P)], axis=1)        # (1, 2P)
    weight_arrays += [w_heads, b_heads]

    # ---- Batch tiling: pad B up to a multiple of the tile (no tb=B OOM cliff) ----
    batch_tile = max(8, (batch_tile // 8) * 8)
    tb = B if B <= batch_tile else batch_tile
    Bp = pl.cdiv(B, tb) * tb
    x_p = _pad2(x, Bp, d_in)
    eps_g = _pad2(eps, Bp, G)          # eps padded only to GROUP (32) lanes
    grid = (Bp // tb,)

    def batched(last):                 # tiled along batch, full along features
        return pl.BlockSpec((tb, last), lambda i: (i, 0))

    def resident(shape):               # same full block for every batch tile
        return pl.BlockSpec(tuple(shape), lambda i: (0, 0))

    in_specs = [batched(d_in)]
    in_specs += [resident(a.shape) for a in weight_arrays]
    in_specs += [batched(G)]

    out_shape = jax.ShapeDtypeStruct((Bp, P), jnp.float32)   # packed output slab
    out_specs = batched(P)

    # ---- Advisory cost estimate (helps XLA schedule around this custom call) ----
    flops_per_row = 0
    r = d_in
    for _ in hidden_params:
        flops_per_row += 2 * r * P
        r = P
    flops_per_row += 2 * r * (2 * P)
    cost = pl.CostEstimate(
        flops=Bp * flops_per_row,
        transcendentals=Bp * 4 * G,
        bytes_accessed=4 * (Bp * (d_in + G + P) + sum(int(a.size) for a in weight_arrays)),
    )

    kernel = functools.partial(
        _tanh_gaussian_kernel, num_hidden=num_hidden, action_dim=a_dim
    )
    packed = pl.pallas_call(
        kernel,
        out_shape=out_shape,
        grid=grid,
        in_specs=in_specs,
        out_specs=out_specs,
        compiler_params=pltpu.CompilerParams(
            dimension_semantics=("parallel",),
        ),
        cost_estimate=cost,
    )(x_p, *weight_arrays, eps_g)

    # ---- Unpack (cheap XLA slices) and strip batch / lane padding ----
    action = packed[:B, 0:a_dim]
    log_prob = packed[:B, a_dim:a_dim + 1]
    z = packed[:B, G:G + a_dim]
    mu = packed[:B, 2 * G:2 * G + a_dim]
    std = packed[:B, 3 * G:3 * G + a_dim]
    return action, log_prob, z, mu, std


def init_params(key, input_size, output_size, hidden_sizes):
    """Mirror the PyTorch module's parameter shapes (weights stored [in, out]).

    Hidden layers: nn.Linear-style uniform(+-1/sqrt(fan_in)).
    mu / log_std heads: xavier_uniform weights, zero bias (init_layer_xavier).
    """
    hidden = []
    in_size = input_size
    for h in hidden_sizes:
        key, kw, kb = jax.random.split(key, 3)
        bound = 1.0 / math.sqrt(in_size)
        w = jax.random.uniform(kw, (in_size, h), jnp.float32, -bound, bound)
        b = jax.random.uniform(kb, (1, h), jnp.float32, -bound, bound)
        hidden.append((w, b))
        in_size = h

    def xavier(k, fan_in, fan_out):
        limit = math.sqrt(6.0 / (fan_in + fan_out))
        return jax.random.uniform(k, (fan_in, fan_out), jnp.float32, -limit, limit)

    key, kmu, kls = jax.random.split(key, 3)
    w_mu = xavier(kmu, in_size, output_size)
    b_mu = jnp.zeros((1, output_size), jnp.float32)
    w_ls = xavier(kls, in_size, output_size)
    b_ls = jnp.zeros((1, output_size), jnp.float32)
    return (hidden, (w_mu, b_mu), (w_ls, b_ls))


def reference_forward(params, x, eps):
    """Pure-JAX reference for the PyTorch forward.

    log_prob uses the reparameterized form -0.5*eps^2 - log_std - log(sqrt(2*pi)),
    analytically identical to Normal(mu, std).log_prob(z) with z = mu + std*eps
    (i.e. dist.rsample()), minus the tanh correction.
    """
    hidden, (w_mu, b_mu), (w_ls, b_ls) = params
    h = x
    for w, b in hidden:
        h = jnp.maximum(h @ w + b, 0.0)
    mu = h @ w_mu + b_mu
    log_std = jnp.tanh(h @ w_ls + b_ls)
    log_std = LOG_STD_MIN + 0.5 * (LOG_STD_MAX - LOG_STD_MIN) * (log_std + 1.0)
    std = jnp.exp(log_std)
    z = mu + std * eps
    action = jnp.tanh(z)
    logp = -0.5 * jnp.square(eps) - log_std - _HALF_LOG_2PI
    logp = logp - jnp.log(1.0 - jnp.square(action) + TANH_EPSILON)
    logp = jnp.sum(logp, axis=-1, keepdims=True)
    return action, logp, z, mu, std


def _check_case(batch, input_size, hidden_sizes, output_size, batch_tile):
    key = jax.random.PRNGKey(0)
    key, kx, keps = jax.random.split(key, 3)
    x = jax.random.normal(kx, (batch, input_size), jnp.float32)
    eps = jax.random.normal(keps, (batch, output_size), jnp.float32)
    params = init_params(key, input_size, output_size, hidden_sizes)

    outs = jax.block_until_ready(
        tanh_gaussian_forward(params, x, eps, batch_tile=batch_tile))
    refs = reference_forward(params, x, eps)

    names = ("action", "log_prob", "z", "mu", "std")
    expected = {
        "action": (batch, output_size),
        "log_prob": (batch, 1),
        "z": (batch, output_size),
        "mu": (batch, output_size),
        "std": (batch, output_size),
    }
    for name, got, want in zip(names, outs, refs):
        assert got.shape == expected[name], (name, got.shape)
        assert jnp.allclose(got, want, atol=1e-4, rtol=1e-4), name


if __name__ == "__main__":
    # Small shapes consistent with the module: batch=2, input=4, hidden=[32,32], action=8.
    _check_case(batch=2, input_size=4, hidden_sizes=[32, 32], output_size=8,
                batch_tile=1024)
    # Exercise the multi-tile grid + batch-padding path (1500 -> 3 tiles of 512).
    _check_case(batch=1500, input_size=4, hidden_sizes=[32, 32], output_size=8,
                batch_tile=512)
    print("KERNEL_OK")
</pallas_src>

<mosaic_0001>
module attributes {stable_mosaic.version = 11 : i64} {
  func.func @_tanh_gaussian_kernel(%arg0: i32, %arg1: memref<2x4xf32, #tpu.memory_space<vmem>>, %arg2: memref<4x128xf32, #tpu.memory_space<vmem>>, %arg3: memref<1x128xf32, #tpu.memory_space<vmem>>, %arg4: memref<128x128xf32, #tpu.memory_space<vmem>>, %arg5: memref<1x128xf32, #tpu.memory_space<vmem>>, %arg6: memref<128x256xf32, #tpu.memory_space<vmem>>, %arg7: memref<1x256xf32, #tpu.memory_space<vmem>>, %arg8: memref<2x32xf32, #tpu.memory_space<vmem>>, %arg9: memref<2x128xf32, #tpu.memory_space<vmem>>) attributes {dimension_semantics = [#tpu.dimension_semantics<parallel>], iteration_bounds = array<i64: 1>, scalar_prefetch = 0 : i64, scratch_operands = 0 : i64, tpu.core_type = #tpu.core_type<tc>, window_params = [{transform_indices = @transform_0, window_bounds = array<i64: 2, 4>}, {pipeline_mode = #tpu.pipeline_mode<synchronous>, transform_indices = @transform_1, window_bounds = array<i64: 4, 128>}, {pipeline_mode = #tpu.pipeline_mode<synchronous>, transform_indices = @transform_2, window_bounds = array<i64: 1, 128>}, {pipeline_mode = #tpu.pipeline_mode<synchronous>, transform_indices = @transform_3, window_bounds = array<i64: 128, 128>}, {pipeline_mode = #tpu.pipeline_mode<synchronous>, transform_indices = @transform_4, window_bounds = array<i64: 1, 128>}, {pipeline_mode = #tpu.pipeline_mode<synchronous>, transform_indices = @transform_5, window_bounds = array<i64: 128, 256>}, {pipeline_mode = #tpu.pipeline_mode<synchronous>, transform_indices = @transform_6, window_bounds = array<i64: 1, 256>}, {transform_indices = @transform_7, window_bounds = array<i64: 2, 32>}, {transform_indices = @transform_8, window_bounds = array<i64: 2, 128>}]} {
    %c0 = arith.constant 0 : index
    %c0_0 = arith.constant 0 : index
    %0 = vector.load %arg1[%c0, %c0_0] : memref<2x4xf32, #tpu.memory_space<vmem>>, vector<2x4xf32>
    %c0_1 = arith.constant 0 : index
    %c0_2 = arith.constant 0 : index
    %1 = vector.load %arg2[%c0_1, %c0_2] : memref<4x128xf32, #tpu.memory_space<vmem>>, vector<4x128xf32>
    %c0_3 = arith.constant 0 : index
    %c0_4 = arith.constant 0 : index
    %2 = vector.load %arg3[%c0_3, %c0_4] : memref<1x128xf32, #tpu.memory_space<vmem>>, vector<1x128xf32>
    %cst = arith.constant dense<0.000000e+00> : vector<2x128xf32>
    %3 = tpu.matmul %0, %1, %cst {dimension_numbers = #tpu.dot_dimension_numbers<[1], [0], [0], [1], [0, 0, 1, 1], [], []>} : vector<2x4xf32>, vector<4x128xf32>, vector<2x128xf32> -> vector<2x128xf32>
    %4 = vector.broadcast %2 : vector<1x128xf32> to vector<2x128xf32>
    %5 = arith.addf %3, %4 : vector<2x128xf32>
    %cst_5 = arith.constant 0.000000e+00 : f32
    %6 = vector.broadcast %cst_5 : f32 to vector<2x128xf32>
    %7 = arith.maximumf %5, %6 : vector<2x128xf32>
    %c0_6 = arith.constant 0 : index
    %c0_7 = arith.constant 0 : index
    %8 = vector.load %arg4[%c0_6, %c0_7] : memref<128x128xf32, #tpu.memory_space<vmem>>, vector<128x128xf32>
    %c0_8 = arith.constant 0 : index
    %c0_9 = arith.constant 0 : index
    %9 = vector.load %arg5[%c0_8, %c0_9] : memref<1x128xf32, #tpu.memory_space<vmem>>, vector<1x128xf32>
    %cst_10 = arith.constant dense<0.000000e+00> : vector<2x128xf32>
    %10 = tpu.matmul %7, %8, %cst_10 {dimension_numbers = #tpu.dot_dimension_numbers<[1], [0], [0], [1], [0, 0, 1, 1], [], []>} : vector<2x128xf32>, vector<128x128xf32>, vector<2x128xf32> -> vector<2x128xf32>
    %11 = vector.broadcast %9 : vector<1x128xf32> to vector<2x128xf32>
    %12 = arith.addf %10, %11 : vector<2x128xf32>
    %cst_11 = arith.constant 0.000000e+00 : f32
    %13 = vector.broadcast %cst_11 : f32 to vector<2x128xf32>
    %14 = arith.maximumf %12, %13 : vector<2x128xf32>
    %c0_12 = arith.constant 0 : index
    %c0_13 = arith.constant 0 : index
    %15 = vector.load %arg6[%c0_12, %c0_13] : memref<128x256xf32, #tpu.memory_space<vmem>>, vector<128x256xf32>
    %cst_14 = arith.constant dense<0.000000e+00> : vector<2x256xf32>
    %16 = tpu.matmul %14, %15, %cst_14 {dimension_numbers = #tpu.dot_dimension_numbers<[1], [0], [0], [1], [0, 0, 1, 1], [], []>} : vector<2x128xf32>, vector<128x256xf32>, vector<2x256xf32> -> vector<2x256xf32>
    %c0_15 = arith.constant 0 : index
    %c0_16 = arith.constant 0 : index
    %17 = vector.load %arg7[%c0_15, %c0_16] : memref<1x256xf32, #tpu.memory_space<vmem>>, vector<1x256xf32>
    %18 = vector.broadcast %17 : vector<1x256xf32> to vector<2x256xf32>
    %19 = arith.addf %16, %18 : vector<2x256xf32>
    %20 = vector.extract_strided_slice %19 {offsets = [0, 0], sizes = [2, 32], strides = [1, 1]} : vector<2x256xf32> to vector<2x32xf32>
    %21 = vector.extract_strided_slice %19 {offsets = [0, 128], sizes = [2, 32], strides = [1, 1]} : vector<2x256xf32> to vector<2x32xf32>
    %22 = math.tanh %21 : vector<2x32xf32>
    %cst_17 = arith.constant 1.000000e+00 : f32
    %23 = vector.broadcast %cst_17 : f32 to vector<2x32xf32>
    %24 = arith.addf %22, %23 : vector<2x32xf32>
    %cst_18 = arith.constant 1.100000e+01 : f32
    %25 = vector.broadcast %cst_18 : f32 to vector<2x32xf32>
    %26 = arith.mulf %25, %24 : vector<2x32xf32>
    %cst_19 = arith.constant -2.000000e+01 : f32
    %27 = vector.broadcast %cst_19 : f32 to vector<2x32xf32>
    %28 = arith.addf %27, %26 : vector<2x32xf32>
    %29 = math.exp %28 : vector<2x32xf32>
    %c0_20 = arith.constant 0 : index
    %c0_21 = arith.constant 0 : index
    %30 = vector.load %arg8[%c0_20, %c0_21] : memref<2x32xf32, #tpu.memory_space<vmem>>, vector<2x32xf32>
    %31 = arith.mulf %29, %30 : vector<2x32xf32>
    %32 = arith.addf %20, %31 : vector<2x32xf32>
    %33 = math.tanh %32 : vector<2x32xf32>
    %34 = arith.mulf %30, %30 : vector<2x32xf32>
    %cst_22 = arith.constant -5.000000e-01 : f32
    %35 = vector.broadcast %cst_22 : f32 to vector<2x32xf32>
    %36 = arith.mulf %35, %34 : vector<2x32xf32>
    %37 = arith.subf %36, %28 : vector<2x32xf32>
    %cst_23 = arith.constant 0.918938517 : f32
    %38 = vector.broadcast %cst_23 : f32 to vector<2x32xf32>
    %39 = arith.subf %37, %38 : vector<2x32xf32>
    %40 = arith.mulf %33, %33 : vector<2x32xf32>
    %cst_24 = arith.constant 1.000000e+00 : f32
    %41 = vector.broadcast %cst_24 : f32 to vector<2x32xf32>
    %42 = arith.subf %41, %40 : vector<2x32xf32>
    %cst_25 = arith.constant 9.99999997E-7 : f32
    %43 = vector.broadcast %cst_25 : f32 to vector<2x32xf32>
    %44 = arith.addf %42, %43 : vector<2x32xf32>
    %45 = math.log %44 : vector<2x32xf32>
    %46 = arith.subf %39, %45 : vector<2x32xf32>
    %47 = tpu.iota {dimensions = array<i32: 1>} : vector<2x32xi32>
    %c8_i32 = arith.constant 8 : i32
    %48 = vector.broadcast %c8_i32 : i32 to vector<2x32xi32>
    %49 = arith.cmpi slt, %47, %48 : vector<2x32xi32>
    %cst_26 = arith.constant 0.000000e+00 : f32
    %50 = vector.broadcast %cst_26 : f32 to vector<2x32xf32>
    %51 = arith.select %49, %46, %50 : vector<2x32xi1>, vector<2x32xf32>
    %cst_27 = arith.constant dense<0.000000e+00> : vector<2xf32>
    %52 = vector.multi_reduction <add>, %51, %cst_27 [1] : vector<2x32xf32> to vector<2xf32>
    %53 = vector.shape_cast %52 : vector<2xf32> to vector<2x1xf32>
    %c8_i32_28 = arith.constant 8 : i32
    %54 = vector.broadcast %c8_i32_28 : i32 to vector<2x32xi32>
    %55 = arith.cmpi eq, %47, %54 : vector<2x32xi32>
    %56 = vector.shape_cast %53 : vector<2x1xf32> to vector<2x1xf32>
    %57 = vector.broadcast %56 : vector<2x1xf32> to vector<2x32xf32>
    %58 = arith.select %55, %57, %33 : vector<2x32xi1>, vector<2x32xf32>
    %c0_29 = arith.constant 0 : index
    %c0_30 = arith.constant 0 : index
    %59 = vector.load %arg9[%c0_29, %c0_30] : memref<2x128xf32, #tpu.memory_space<vmem>>, vector<2x32xf32>
    tpu.vector_store %arg9[%c0_29, %c0_30], %58 {strides = array<i32>} : memref<2x128xf32, #tpu.memory_space<vmem>>, vector<2x32xf32>,
    %c0_31 = arith.constant 0 : index
    %c32 = arith.constant 32 : index
    %60 = vector.load %arg9[%c0_31, %c32] : memref<2x128xf32, #tpu.memory_space<vmem>>, vector<2x32xf32>
    tpu.vector_store %arg9[%c0_31, %c32], %32 {strides = array<i32>} : memref<2x128xf32, #tpu.memory_space<vmem>>, vector<2x32xf32>,
    %c0_32 = arith.constant 0 : index
    %c64 = arith.constant 64 : index
    %61 = vector.load %arg9[%c0_32, %c64] : memref<2x128xf32, #tpu.memory_space<vmem>>, vector<2x32xf32>
    tpu.vector_store %arg9[%c0_32, %c64], %20 {strides = array<i32>} : memref<2x128xf32, #tpu.memory_space<vmem>>, vector<2x32xf32>,
    %c0_33 = arith.constant 0 : index
    %c96 = arith.constant 96 : index
    %62 = vector.load %arg9[%c0_33, %c96] : memref<2x128xf32, #tpu.memory_space<vmem>>, vector<2x32xf32>
    tpu.vector_store %arg9[%c0_33, %c96], %29 {strides = array<i32>} : memref<2x128xf32, #tpu.memory_space<vmem>>, vector<2x32xf32>,
    return
  }
  func.func @transform_0(%arg0: i32) -> (i32, i32) {
    %c0_i32 = arith.constant 0 : i32
    %c0_i32_0 = arith.constant 0 : i32
    return %arg0, %c0_i32 : i32, i32
  }
  func.func @transform_1(%arg0: i32) -> (i32, i32) {
    %c0_i32 = arith.constant 0 : i32
    %c0_i32_0 = arith.constant 0 : i32
    %c0_i32_1 = arith.constant 0 : i32
    return %c0_i32, %c0_i32_0 : i32, i32
  }
  func.func @transform_2(%arg0: i32) -> (i32, i32) {
    %c0_i32 = arith.constant 0 : i32
    %c0_i32_0 = arith.constant 0 : i32
    %c0_i32_1 = arith.constant 0 : i32
    return %c0_i32, %c0_i32_0 : i32, i32
  }
  func.func @transform_3(%arg0: i32) -> (i32, i32) {
    %c0_i32 = arith.constant 0 : i32
    %c0_i32_0 = arith.constant 0 : i32
    %c0_i32_1 = arith.constant 0 : i32
    return %c0_i32, %c0_i32_0 : i32, i32
  }
  func.func @transform_4(%arg0: i32) -> (i32, i32) {
    %c0_i32 = arith.constant 0 : i32
    %c0_i32_0 = arith.constant 0 : i32
    %c0_i32_1 = arith.constant 0 : i32
    return %c0_i32, %c0_i32_0 : i32, i32
  }
  func.func @transform_5(%arg0: i32) -> (i32, i32) {
    %c0_i32 = arith.constant 0 : i32
    %c0_i32_0 = arith.constant 0 : i32
    %c0_i32_1 = arith.constant 0 : i32
    return %c0_i32, %c0_i32_0 : i32, i32
  }
  func.func @transform_6(%arg0: i32) -> (i32, i32) {
    %c0_i32 = arith.constant 0 : i32
    %c0_i32_0 = arith.constant 0 : i32
    %c0_i32_1 = arith.constant 0 : i32
    return %c0_i32, %c0_i32_0 : i32, i32
  }
  func.func @transform_7(%arg0: i32) -> (i32, i32) {
    %c0_i32 = arith.constant 0 : i32
    %c0_i32_0 = arith.constant 0 : i32
    return %arg0, %c0_i32 : i32, i32
  }
  func.func @transform_8(%arg0: i32) -> (i32, i32) {
    %c0_i32 = arith.constant 0 : i32
    %c0_i32_0 = arith.constant 0 : i32
    return %arg0, %c0_i32 : i32, i32
  }
}

</mosaic_0001>

<bundles_post_ra>
// kernel: tpu_custom_call.1
= control target key start
LH: loop header
LB: loop body
LE: loop exit
PB: predicated region body
PF: predicated region fallthrough
CT: control target
= control target key end

     0   :  { %13 = vsyncpa [#allocation3], 0  ;;  %s837_s0 = inlined_call_operand.hbm [shape: f32[2,4], index: 0, kind: input, shape index: {}]   ;;  %s838_s1 = inlined_call_operand.hbm [shape: f32[4,128], index: 1, kind: input, shape index: {}]   ;;  %s839_s2 = inlined_call_operand.vmem [shape: f32[1,128], index: 2, kind: input, shape index: {}]   ;;  %s840_s3 = inlined_call_operand.hbm [shape: f32[128,128], index: 3, kind: input, shape index: {}]   ;;  %s841_s4 = inlined_call_operand.vmem [shape: f32[1,128], index: 4, kind: input, shape index: {}]   ;;  %s842_s5 = inlined_call_operand.hbm [shape: f32[128,256], index: 5, kind: input, shape index: {}]   ;;  %s843_s6 = inlined_call_operand.vmem [shape: f32[1,256], index: 6, kind: input, shape index: {}]   ;;  %s844_s7 = inlined_call_operand.vmem [shape: f32[2,32], index: 7, kind: input, shape index: {}]   ;;  %s845_s8 = inlined_call_operand.hbm [shape: f32[2,128], index: 8, kind: output, shape index: {}]  }
   0x1   :  { %14 = vsyncpa [#allocation6], 0 }
   0x2   :  { %15 = vsyncpa [#allocation9], 0 }
   0x3   :  { %16 = vsyncpa [#allocation4], 0  ;;  %s705_s27 = smov [#allocation5]   ;;  %s706_s29 = smov [#allocation2]  }
   0x4   :  { %s33_s28 = sshll.u32 %s705_s27, 4  ;;  %s23_s30 = sshll.u32 %s706_s29, 4  ;;  %s34_s28 = int_to_ptr.vmem [resolvable:$true] %s33_s28  ;;  %s24_s30 = int_to_ptr.vmem [resolvable:$true] %s23_s30 }
   0x5   :  { %s587_s11 = scalar_lea.hbm %s838_s1, 64 }
   0x6   :  { %p588_p0 = scmp.ne.s32.totalorder %s838_s1, %s587_s11  ;;  %p591_p1 = scmp.lt.u32.totalorder %s587_s11, %s838_s1 }
   0x8   :  { %p593_p2 = pnand %p591_p1, %p588_p0 }
   0xa   :  { %596 = shalt.err (!%p593_p2)
}
   0xb   :  { %s597_s16 = scalar_lea.vmem %s34_s28, 64  ;;  %p602_p4 = scmp.lt.s32.totalorder %s34_s28, %s34_s28 }
   0xc   :  { %p598_p3 = scmp.ne.s32.totalorder %s34_s28, %s597_s16  ;;  %p603_p5 = scmp.lt.s32.totalorder %s597_s16, %s597_s16 }
   0xe   :  { %p604_p6 = por %p603_p5, %p602_p4 }
  0x10   :  { %p605_p7 = pnand %p604_p6, %p598_p3 }
  0x12   :  { %608 = shalt.err (!%p605_p7)
}
  0x13   :  { %36 = dma.hbm_to_vmem [thread:$0]  %s838_s1, 64, %s34_s28, [#allocation6]  }
  0x14   :  { %s609_s21 = scalar_lea.hbm %s837_s0, 32 }
  0x15   :  { %p610_p8 = scmp.ne.s32.totalorder %s837_s0, %s609_s21  ;;  %p613_p9 = scmp.lt.u32.totalorder %s609_s21, %s837_s0 }
  0x17   :  { %p615_p10 = pnand %p613_p9, %p610_p8 }
  0x19   :  { %618 = shalt.err (!%p615_p10)
}
  0x1a   :  { %s619_s26 = scalar_lea.vmem %s24_s30, 32  ;;  %p624_p12 = scmp.lt.s32.totalorder %s24_s30, %s24_s30 }
  0x1b   :  { %p620_p11 = scmp.ne.s32.totalorder %s24_s30, %s619_s26  ;;  %p625_p13 = scmp.lt.s32.totalorder %s619_s26, %s619_s26 }
  0x1d   :  { %p626_p0 = por %p625_p13, %p624_p12 }
  0x1f   :  { %p627_p1 = pnand %p626_p0, %p620_p11 }
  0x21   :  { %630 = shalt.err (!%p627_p1)
}
  0x22   :  { %26 = dma.hbm_to_vmem [thread:$0]  %s837_s0, 32, %s24_s30, [#allocation3]  }
  0x23   :  { %s707_s28 = smov [#allocation7]   ;;  %s631_s11 = scalar_lea.hbm %s840_s3, 2048 }
  0x24   :  { %s44_s29 = sshll.u32 %s707_s28, 4  ;;  %p632_p2 = scmp.ne.s32.totalorder %s840_s3, %s631_s11  ;;  %s45_s29 = int_to_ptr.vmem [resolvable:$true] %s44_s29 }
  0x25   :  { %p635_p3 = scmp.lt.u32.totalorder %s631_s11, %s840_s3 }
  0x27   :  { %p637_p4 = pnand %p635_p3, %p632_p2 }
  0x29   :  { %640 = shalt.err (!%p637_p4)
}
  0x2a   :  { %s641_s16 = scalar_lea.vmem %s45_s29, 2048  ;;  %p646_p6 = scmp.lt.s32.totalorder %s45_s29, %s45_s29 }
  0x2b   :  { %p642_p5 = scmp.ne.s32.totalorder %s45_s29, %s641_s16  ;;  %p647_p7 = scmp.lt.s32.totalorder %s641_s16, %s641_s16 }
  0x2d   :  { %p648_p8 = por %p647_p7, %p646_p6 }
  0x2f   :  { %p649_p9 = pnand %p648_p8, %p642_p5 }
  0x31   :  { %652 = shalt.err (!%p649_p9)
}
  0x32   :  { %s708_s0 = smov 128   ;;  %s709_s30 = smov 8  }
  0x33   :  { %50 = dma.hbm_to_vmem [thread:$0]  %s840_s3, 2048, %s45_s29, [#allocation6], %s708_s0, %s708_s0, %s709_s30  }
  0x34   :  { %s710_s19 = smov [#allocation8]   ;;  %s653_s23 = scalar_lea.hbm %s842_s5, 4096 }
  0x35   :  { %s58_s20 = sshll.u32 %s710_s19, 4  ;;  %p654_p10 = scmp.ne.s32.totalorder %s842_s5, %s653_s23  ;;  %s59_s20 = int_to_ptr.vmem [resolvable:$true] %s58_s20 }
  0x36   :  { %p657_p11 = scmp.lt.u32.totalorder %s653_s23, %s842_s5 }
  0x38   :  { %p659_p12 = pnand %p657_p11, %p654_p10 }
  0x3a   :  { %662 = shalt.err (!%p659_p12)
}
  0x3b   :  { %s663_s27 = scalar_lea.vmem %s59_s20, 4096  ;;  %p668_p0 = scmp.lt.s32.totalorder %s59_s20, %s59_s20 }
  0x3c   :  { %p664_p13 = scmp.ne.s32.totalorder %s59_s20, %s663_s27  ;;  %p669_p1 = scmp.lt.s32.totalorder %s663_s27, %s663_s27 }
  0x3e   :  { %p670_p2 = por %p669_p1, %p668_p0 }
  0x40   :  { %p671_p3 = pnand %p670_p2, %p664_p13 }
  0x42   :  { %674 = shalt.err (!%p671_p3)
}
  0x43   :  { %s711_s3 = smov 256   ;;  %s712_s28 = smov 16  }
  0x44   :  { %64 = dma.hbm_to_vmem [thread:$0]  %s842_s5, 4096, %s59_s20, [#allocation9], %s711_s3, %s711_s3, %s712_s28  }
  0x45   :  { %697 = dma.done.wait [#allocation3], 32  }
  0x46   :  { %698 = vsyncadd [#allocation3], 4294967264 }
  0x47   :  { %699 = dma.done.wait [#allocation6], 2112  }
  0x48   :  { %700 = vsyncadd [#allocation6], 4294965184 }
  0x49   :  { %701 = dma.done.wait [#allocation9], 4096  }
  0x4a   :  { %702 = vsyncadd [#allocation9], 4294963200  ;;  %v713_v0 = vmov 0.0   ;;  %vm714_vm0 = vmmov 0   ;;  %v715_v1 = vmov 0.0|0.0   ;;  %vm94_vm1 = vcmask 1043456  }
  0x4b   :  { %468 = vmatprep.subr.mxu0 %v713_v0  ;;  %470 = vmatprep.mubr.msk.f32.mxu0 %vm714_vm0, %v713_v0  ;;  %vm90_vm2 = vcmask 31744   ;;  %v82_v2 = vld [vmem:[#allocation5] sm:$0xf]  ;;  %v81_v3 = vld [vmem:[#allocation2] sm:$0x3]  ;;  %v169_v4 = vld [vmem:[#allocation7] sm:$0xff] }
  0x4c   :  { %508 = vmatprep.subr.bf16.mxu1 %v715_v1  ;;  %505 = vmatprep.mubr.msk.f32.mxu1 %vm714_vm0, %v713_v0  ;;  %v170_v5 = vld [vmem:[#allocation7 + $0x8] sm:$0xff]  ;;  %v171_v6 = vld [vmem:[#allocation7 + $0x10] sm:$0xff]  ;;  %v172_v7 = vld [vmem:[#allocation7 + $0x18] sm:$0xff]  ;;  %vm402_vm4 = vcmask 254976   ;;  %vm413_vm6 = vcmask 517376   ;;  %s719_s16 = smov [#allocation10]  }
  0x4d   :  { %469 = vmatpush3.msk.msra.mxu0 %vm94_vm1, %v82_v2  ;;  %v509_v8 = vpack.c.bf16 %v170_v5, %v169_v4  ;;  %v512_v9 = vpack.c.bf16 %v172_v7, %v171_v6  ;;  %v173_v10 = vld [vmem:[#allocation7 + $0x20] sm:$0xff]  ;;  %v174_v11 = vld [vmem:[#allocation7 + $0x28] sm:$0xff]  ;;  %v175_v13 = vld [vmem:[#allocation7 + $0x30] sm:$0xff]  ;;  %s433_s0 = sshll.u32 %s719_s16, 4  ;;  %vm419_vm7 = vcmask 779776   ;;  %vm425_vm8 = vcmask 1042176   ;;  %s434_s0 = int_to_ptr.vmem [resolvable:$true] %s433_s0 }
  0x4e   :  { %471 = vmatmul.mubr.msk.f32.vlgmr.msra.gmra.mrb[0].mxu0 %vm90_vm2, %v81_v3  ;;  %v515_v12 = vpack.c.bf16 %v174_v11, %v173_v10  ;;  %v176_v14 = vld [vmem:[#allocation7 + $0x38] sm:$0xff]  ;;  %v177_v16 = vld [vmem:[#allocation7 + $0x40] sm:$0xff]  ;;  %v178_v17 = vld [vmem:[#allocation7 + $0x48] sm:$0xff]  ;;  %s675_s30 = scalar_lea.vmem %s434_s0, 32  ;;  %p680_p5 = scmp.lt.s32.totalorder %s434_s0, %s434_s0 }
  0x4f   :  { %371 = vmatprep.mubr.f32.mxu0 %v713_v0  ;;  %510 = vmatpush3.bf16.msra.mxu1 %v509_v8  ;;  %v518_v15 = vpack.c.bf16 %v176_v14, %v175_v13  ;;  %v521_v18 = vpack.c.bf16 %v178_v17, %v177_v16  ;;  %v179_v19 = vld [vmem:[#allocation7 + $0x50] sm:$0xff]  ;;  %v180_v20 = vld [vmem:[#allocation7 + $0x58] sm:$0xff]  ;;  %v181_v22 = vld [vmem:[#allocation7 + $0x60] sm:$0xff]  ;;  %p676_p4 = scmp.ne.s32.totalorder %s434_s0, %s675_s30  ;;  %p681_p6 = scmp.lt.s32.totalorder %s675_s30, %s675_s30 }
  0x50   :  { %511 = vmatprep.subr.bf16.mxu1 %v715_v1  ;;  %v524_v21 = vpack.c.bf16 %v180_v20, %v179_v19  ;;  %v182_v23 = vld [vmem:[#allocation7 + $0x68] sm:$0xff]  ;;  %v183_v25 = vld [vmem:[#allocation7 + $0x70] sm:$0xff]  ;;  %v184_v26 = vld [vmem:[#allocation7 + $0x78] sm:$0xff] }
  0x51   :  { %v527_v24 = vpack.c.bf16 %v182_v23, %v181_v22  ;;  %v530_v27 = vpack.c.bf16 %v184_v26, %v183_v25  ;;  %v264_v28 = vld [vmem:[#allocation8 + $0x8] sm:$0xff]  ;;  %v266_v29 = vld [vmem:[#allocation8 + $0x18] sm:$0xff]  ;;  %v263_v30 = vld [vmem:[#allocation8] sm:$0xff]  ;;  %v297_v22 = vlaneseq  ;;  %p682_p7 = por %p681_p6, %p680_p5 }
  0x52   :  { %v532_v31 = vpack.c.bf16 %v266_v29, %v264_v28  ;;  %v265_v32 = vld [vmem:[#allocation8 + $0x10] sm:$0xff]  ;;  %v268_v33 = vld [vmem:[#allocation8 + $0x28] sm:$0xff]  ;;  %v270_v34 = vld [vmem:[#allocation8 + $0x38] sm:$0xff] }
  0x53   :  { %513 = vmatpush3.bf16.msra.mxu1 %v512_v9  ;;  %v534_v35 = vpack.c.bf16 %v265_v32, %v263_v30  ;;  %v536_v36 = vpack.c.bf16 %v270_v34, %v268_v33  ;;  %v267_v37 = vld [vmem:[#allocation8 + $0x20] sm:$0xff]  ;;  %v269_v38 = vld [vmem:[#allocation8 + $0x30] sm:$0xff]  ;;  %v272_v39 = vld [vmem:[#allocation8 + $0x48] sm:$0xff]  ;;  %v298_v23 = vshrl.u32 %v297_v22, 7  ;;  %p683_p8 = pnand %p682_p7, %p676_p4 }
  0x54   :  { %514 = vmatprep.subr.bf16.mxu1 %v715_v1  ;;  %533 = vmatprep.subr.bf16.mxu0 %v532_v31  ;;  %v274_v40 = vld [vmem:[#allocation8 + $0x58] sm:$0xff]  ;;  %v538_v41 = vpack.c.bf16 %v269_v38, %v267_v37  ;;  %v271_v43 = vld [vmem:[#allocation8 + $0x40] sm:$0xff]  ;;  %v273_v44 = vld [vmem:[#allocation8 + $0x50] sm:$0xff] }
  0x55   :  { %535 = vmatpush1.bf16.msra.mxu0 %v534_v35  ;;  %v540_v42 = vpack.c.bf16 %v274_v40, %v272_v39  ;;  %v276_v45 = vld [vmem:[#allocation8 + $0x68] sm:$0xff]  ;;  %v278_v46 = vld [vmem:[#allocation8 + $0x78] sm:$0xff]  ;;  %v542_v47 = vpack.c.bf16 %v273_v44, %v271_v43  ;;  %v275_v49 = vld [vmem:[#allocation8 + $0x60] sm:$0xff]  ;;  %v303_v26 = vsub.s32 1, %v298_v23 }
  0x56   :  { %537 = vmatprep.subr.bf16.mxu0 %v536_v36  ;;  %v544_v48 = vpack.c.bf16 %v278_v46, %v276_v45  ;;  %v277_v50 = vld [vmem:[#allocation8 + $0x70] sm:$0xff]  ;;  %v280_v51 = vld [vmem:[#allocation8 + $0x88] sm:$0xff]  ;;  %v282_v52 = vld [vmem:[#allocation8 + $0x98] sm:$0xff] }
  0x57   :  { %516 = vmatpush3.bf16.msra.mxu1 %v515_v12  ;;  %v546_v53 = vpack.c.bf16 %v277_v50, %v275_v49  ;;  %v548_v54 = vpack.c.bf16 %v282_v52, %v280_v51  ;;  %v279_v55 = vld [vmem:[#allocation8 + $0x80] sm:$0xff]  ;;  %v281_v56 = vld [vmem:[#allocation8 + $0x90] sm:$0xff]  ;;  %v284_v57 = vld [vmem:[#allocation8 + $0xa8] sm:$0xff]  ;;  %v399_v49 = vand.u32 127, %v297_v22 }
  0x58   :  { %517 = vmatprep.subr.bf16.mxu1 %v715_v1  ;;  %v286_v58 = vld [vmem:[#allocation8 + $0xb8] sm:$0xff]  ;;  %v550_v59 = vpack.c.bf16 %v281_v56, %v279_v55  ;;  %v283_v61 = vld [vmem:[#allocation8 + $0xa0] sm:$0xff]  ;;  %v285_v62 = vld [vmem:[#allocation8 + $0xb0] sm:$0xff] }
  0x59   :  { %539 = vmatpush1.bf16.msra.mxu0 %v538_v41  ;;  %v552_v60 = vpack.c.bf16 %v286_v58, %v284_v57  ;;  %v288_v63 = vld [vmem:[#allocation8 + $0xc8] sm:$0xff]  ;;  %v290_v0 = vld [vmem:[#allocation8 + $0xd8] sm:$0xff]  ;;  %v287_v3 = vld [vmem:[#allocation8 + $0xc0] sm:$0xff]  ;;  %vm400_vm3 = vcmp.lt.s32.totalorder %v399_v49, 8  ;;  %vm406_vm5 = vcmp.eq.s32.totalorder %v399_v49, 8 }
  0x5a   :  { %541 = vmatprep.subr.bf16.mxu0 %v540_v42  ;;  %v556_v2 = vpack.c.bf16 %v290_v0, %v288_v63  ;;  %v289_v4 = vld [vmem:[#allocation8 + $0xd0] sm:$0xff]  ;;  %v444_v6 = vld [vmem:[%s839_s2] ss:$0 sm:$0xff]  ;;  %v292_v11 = vld [vmem:[#allocation8 + $0xe8] sm:$0xff] }
  0x5b   :  { %519 = vmatpush3.bf16.msra.mxu1 %v518_v15  ;;  %v558_v5 = vpack.c.bf16 %v289_v4, %v287_v3  ;;  %v294_v12 = vld [vmem:[#allocation8 + $0xf8] sm:$0xff]  ;;  %v291_v14 = vld [vmem:[#allocation8 + $0xe0] sm:$0xff]  ;;  %v293_v15 = vld [vmem:[#allocation8 + $0xf0] sm:$0xff] }
  0x5c   :  { %520 = vmatprep.subr.bf16.mxu1 %v715_v1  ;;  %v560_v13 = vpack.c.bf16 %v294_v12, %v292_v11  ;;  %v562_v16 = vpack.c.bf16 %v293_v15, %v291_v14  ;;  %v447_v17 = vld [vmem:[%s841_s4] ss:$0 sm:$0xff]  ;;  %s716_s4 = smov 64  }
  0x5d   :  { %543 = vmatpush1.bf16.msra.mxu0 %v542_v47  ;;  %v295_v25 = vld [vmem:[%s843_s6] sm:$0x3]  ;;  %s717_s6 = smov 96  }
  0x5e   :  { %545 = vmatprep.subr.bf16.mxu0 %v544_v48  ;;  %v304_v28 = vrot.slane %v295_v25, %v303_v26  ;;  %v384_v39 = vld [vmem:[%s844_s7] sm:$0x3]  ;;  %s718_s7 = smov 32  }
  0x5f   :  { %522 = vmatpush3.bf16.msra.mxu1 %v521_v18  ;;  %v388_v46 = vmul.f32 %v384_v39, %v384_v39 }
  0x60   :  { %523 = vmatprep.subr.bf16.mxu1 %v715_v1 }
  0x61   :  { %547 = vmatpush1.bf16.msra.mxu0 %v546_v53  ;;  %v389_v47 = vmul.f32 -0.5, %v388_v46 }
  0x62   :  { %549 = vmatprep.subr.bf16.mxu0 %v548_v54 }
  0x63   :  { %525 = vmatpush3.bf16.msra.mxu1 %v524_v21 }
  0x64   :  { %526 = vmatprep.subr.bf16.mxu1 %v715_v1 }
  0x65   :  { %551 = vmatpush1.bf16.msra.mxu0 %v550_v59 }
  0x66   :  { %553 = vmatprep.subr.bf16.mxu0 %v552_v60 }
  0x67   :  { %528 = vmatpush3.bf16.msra.mxu1 %v527_v24  ;;  %v299_v24 = vsub.s32 0, %v298_v23 }
  0x68   :  { %529 = vmatprep.subr.bf16.mxu1 %v715_v1  ;;  %v554_v1 = vpack.c.bf16 %v285_v62, %v283_v61 }
  0x6a   :  { %555 = vmatpush1.bf16.msra.mxu0 %v554_v1 }
  0x6b   :  { %531 = vmatpush3.bf16.msra.mxu1 %v530_v27  ;;  %557 = vmatprep.subr.bf16.mxu0 %v556_v2  ;;  %v300_v27 = vrot.slane %v295_v25, %v299_v24 }
  0x6e   :  { %559 = vmatpush1.bf16.msra.mxu0 %v558_v5 }
  0x6f   :  { %561 = vmatprep.subr.bf16.mxu0 %v560_v13 }
  0x72   :  { %563 = vmatpush1.bf16.msra.mxu0 %v562_v16 }
 0x121   :  { %v164_v7 = vpop.f32.mrb[0].mxu0 }
 0x122   :  { %v165_v8 = vadd.f32 %v444_v6, %v164_v7  ;;  %v472_v9 = vpop.f32.mrb[1].mxu0 }
 0x124   :  { %v168_v10 = vmax.f32 %v165_v8, 0.0 }
 0x126   :  { %506 = vmatmul.mubr.f32.vlgmr.msra.gmra.mrb[0].mxu1 %v168_v10 }
 0x1f9   :  { %v258_v18 = vpop.f32.mrb[0].mxu1 }
 0x1fa   :  { %v259_v19 = vadd.f32 %v447_v17, %v258_v18  ;;  %v507_v20 = vpop.f32.mrb[1].mxu1 }
 0x1fc   :  { %v262_v21 = vmax.f32 %v259_v19, 0.0 }
 0x1fe   :  { %372 = vmatmul.mubr.f32.vlgmr.msra.gmra.mrb[2].mxu0 %v262_v21 }
 0x2d1   :  { %v373_v29 = vpop.f32.mrb[2].mxu0 }
 0x2d2   :  { %v374_v30 = vadd.f32 %v373_v29, %v300_v27  ;;  %v375_v31 = vpop.f32.mrb[3].mxu0 }
 0x2d3   :  { %v376_v32 = vadd.f32 %v375_v31, %v304_v28 }
 0x2d4   :  { %416 = vrot.lane.b32.xlu1 %v374_v30, %s716_s4 }
 0x2d5   :  { %579 = vtanh.f32 %v376_v32 }
 0x2df   :  { %v580_v33 = vpop.eup %579 }
 0x2e0   :  { %v379_v34 = vadd.f32 1.0, %v580_v33 }
 0x2e2   :  { %v380_v35 = vmul.f32 11.0, %v379_v34 }
 0x2e4   :  { %v381_v36 = vadd.f32 -20.0, %v380_v35 }
 0x2e6   :  { %v382_v37 = vmul.f32 1.442695, %v381_v36  ;;  %v390_v48 = vsub.f32 %v389_v47, %v381_v36 }
 0x2e8   :  { %581 = vpow2.f32 %v382_v37  ;;  %v448_v51 = vadd.f32 -0.9189385, %v390_v48 }
 0x2f2   :  { %v582_v38 = vpop.eup %581 }
 0x2f3   :  { %422 = vrot.lane.b32.xlu1 %v582_v38, %s717_s6  ;;  %v385_v40 = vmul.f32 %v582_v38, %v384_v39 }
 0x2f5   :  { %v386_v41 = vadd.f32 %v385_v40, %v374_v30 }
 0x2f7   :  { %583 = vtanh.f32 %v386_v41 }
 0x301   :  { %v584_v42 = vpop.eup %583 }
 0x302   :  { %v392_v43 = vmul.f32 %v584_v42, %v584_v42 }
 0x304   :  { %v393_v44 = vsub.f32 1.0, %v392_v43 }
 0x306   :  { %v394_v45 = vadd.f32 1e-06, %v393_v44 }
 0x308   :  { %585 = vlog2.f32 %v394_v45 }
 0x312   :  { %v586_v50 = vpop.eup %585 }
 0x313   :  { %v396_v52 = vmul.f32 0.6931472, %v586_v50 }
 0x315   :  { %v397_v53 = vsub.f32 %v448_v51, %v396_v52 }
 0x317   :  { %v401_v54 = vsel %vm400_vm3, %v397_v53, 0.0 }
 0x318   :  { %v403_v55 = vsel %vm402_vm4, %v401_v54, 0.0 }
 0x319   :  { %404 = vadd.xlane.f32.xlu0 %v403_v55 }
 0x32f   :  { %410 = vrot.lane.b32.xlu0 %v386_v41, %s718_s7 }
 0x346   :  { %v417_v58 = vpop.permute.xlu1 %416 }
 0x365   :  { %v423_v60 = vpop.permute.xlu1 %422 }
 0x3a6   :  { %v405_v56 = vpop.xlane.xlu0 %404 }
 0x3a7   :  { %v407_v57 = vsel %vm406_vm5, %v405_v56, %v584_v42 }
 0x3a8   :  { %408 = vst.msk [vmem:[#allocation10] sm:$0x3] %vm402_vm4, %v407_v57 }
 0x3aa   :  { %v411_v59 = vpop.permute.xlu0 %410 }
 0x3ab   :  { %414 = vst.msk [vmem:[#allocation10] sm:$0x3] %vm413_vm6, %v411_v59 }
 0x3ac   :  { %420 = vst.msk [vmem:[#allocation10] sm:$0x3] %vm419_vm7, %v417_v58 }
 0x3ad   :  { %426 = vst.msk [vmem:[#allocation10] sm:$0x3] %vm425_vm8, %v423_v60 }
 0x3ae   :  { %686 = shalt.err (!%p683_p8)
}
 0x3af   :  { %s687_s19 = scalar_lea.hbm %s845_s8, 32 }
 0x3b0   :  { %p688_p9 = scmp.ne.s32.totalorder %s845_s8, %s687_s19  ;;  %p691_p10 = scmp.lt.u32.totalorder %s687_s19, %s845_s8 }
 0x3b2   :  { %p693_p11 = pnand %p691_p10, %p688_p9 }
 0x3b4   :  { %696 = shalt.err (!%p693_p11)
}
 0x3b5   :  { %436 = dma.vmem_to_hbm [thread:$0]  %s434_s0, 32, %s845_s8, [#allocation4]  }
 0x3b6   :  { %703 = dma.done.wait [#allocation4], 32  }
 0x3b7   :  { %704 = vsyncadd [#allocation4], 4294967264 }
 0x3b8   :  { %440 = vsyncpa [#allocation3], 1 }
 0x3b9   :  { %441 = vsyncpa [#allocation6], 1 }
 0x3ba   :  { %442 = vsyncpa [#allocation9], 1 }
 0x3bb   :  { %443 = vsyncpa [#allocation4], 1 }

</bundles_post_ra>
